<compile_context>
chip_gen: v7x
topology: tpu7x:2x2x1
jax: 0.10.0
libtpu: 0.0.40
codegen_flags: <defaults>
</compile_context>

<pallas_src>
import math
import functools

import jax
import jax.numpy as jnp
from jax import lax
from jax.experimental import pallas as pl
from jax.experimental.pallas import tpu as pltpu

N_EMBD = 64
BLOCK_SIZE = 32
N_HEADS = 4
HEAD_SIZE = N_EMBD // N_HEADS
LN_EPS = 1e-5
NEG_INF = -1e30   # finite mask value: exp(NEG_INF - max) underflows to exactly 0


def _layer_norm(x, gamma, beta):
    mu = jnp.mean(x, axis=-1, keepdims=True)
    var = jnp.mean((x - mu) ** 2, axis=-1, keepdims=True)
    return (x - mu) * lax.rsqrt(var + LN_EPS) * gamma + beta


def block_kernel(x_ref,
                 g1_ref, b1_ref,
                 wqkv_ref,
                 wp_ref, bp_ref,
                 g2_ref, b2_ref,
                 w1_ref, bf1_ref,
                 w2_ref, bf2_ref,
                 o_ref,
                 *, seq, n_heads):
    M, C = x_ref.shape            # M = Bt * T rows handled this grid step
    bt = M // seq
    hs = C // n_heads
    cd = wqkv_ref.dtype           # compute dtype for matmul operands (bf16 or f32)

    x = x_ref[...]                                            # (M, C) f32

    # ---- LayerNorm 1 (row-wise over all Bt*T rows, fp32) ----
    xn = _layer_norm(x, g1_ref[0], b1_ref[0])

    # ---- Fused QKV projection: one (M,C)x(C,3C) matmul, fp32 accumulation.
    #      The 1/sqrt(C) attention scale is already folded into the Q columns. ----
    qkv = jnp.dot(xn.astype(cd), wqkv_ref[...],
                  preferred_element_type=jnp.float32)         # (M, 3C) f32
    qkv = qkv.reshape(bt, seq, 3 * C)

    # Additive causal bias, built once per invocation.
    row = lax.broadcasted_iota(jnp.int32, (seq, seq), 0)
    col = lax.broadcasted_iota(jnp.int32, (seq, seq), 1)
    bias = jnp.where(row >= col, 0.0, NEG_INF).astype(jnp.float32)   # (T, T)

    # Head-column index, built once (used to mask the full-width V per head).
    cidx = lax.broadcasted_iota(jnp.int32, (1, 1, C), 2)

    # Full-width V (aligned 64-lane slice at lane offset 2C), cast once.
    v_cd = qkv[:, :, 2 * C:3 * C].astype(cd)                  # (bt, T, C)

    # Multi-head attention: static n_heads=4 loop, 3-D single-batch-dim einsums
    # (the proven Mosaic lowering pattern).  Head outputs are accumulated into
    # their own column block via a masked full-width V -> no concatenate, no
    # per-head V lane slices.
    attn = jnp.zeros((bt, seq, C), jnp.float32)
    for h in range(n_heads):
        qh = qkv[:, :, h * hs:(h + 1) * hs].astype(cd)            # (bt, T, hs)
        kh = qkv[:, :, C + h * hs:C + (h + 1) * hs].astype(cd)    # (bt, T, hs)

        s = jnp.einsum('bqd,bkd->bqk', qh, kh,
                       preferred_element_type=jnp.float32)        # (bt, T, T) f32
        s = s + bias
        s = s - jnp.max(s, axis=-1, keepdims=True)
        p = jnp.exp(s)
        p = p * pl.reciprocal(jnp.sum(p, axis=-1, keepdims=True), approx=True)

        m_h = jnp.logical_and(cidx >= h * hs, cidx < (h + 1) * hs).astype(cd)
        attn = attn + jnp.einsum('bqk,bkc->bqc', p.astype(cd), v_cd * m_h,
                                 preferred_element_type=jnp.float32)

    attn2 = attn.reshape(M, C)
    proj = jnp.dot(attn2.astype(cd), wp_ref[...],
                   preferred_element_type=jnp.float32) + bp_ref[0]

    x1 = x + proj                                             # residual (fp32)

    # ---- LayerNorm 2 + FeedForward ----
    xn2 = _layer_norm(x1, g2_ref[0], b2_ref[0])
    h1 = jnp.dot(xn2.astype(cd), w1_ref[...],
                 preferred_element_type=jnp.float32) + bf1_ref[0]
    h1 = jnp.maximum(h1, 0.0)
    ffn = jnp.dot(h1.astype(cd), w2_ref[...],
                  preferred_element_type=jnp.float32) + bf2_ref[0]

    o_ref[...] = x1 + ffn


def _pick_batch_tile(B, T, target_rows=1024, max_rows=2048):
    """Pick Bt (a divisor of B) such that:
       * rows = Bt*T is a multiple of 8 (or Bt == B, i.e. the full array),
       * there are >= 2 grid tiles whenever B > 1 (v7x: 2 TensorCores),
       * rows is the smallest value reaching target_rows, else the largest
         value within the v7x-safe max_rows cap."""
    cands = [d for d in range(1, B + 1)
             if B % d == 0 and ((d * T) % 8 == 0 or d == B)]
    if B > 1:
        multi = [d for d in cands if (B // d) >= 2]
        if multi:
            cands = multi
    within = [d for d in cands if d * T <= max_rows]
    pool = within if within else cands
    hit = [d for d in pool if d * T >= target_rows]
    return hit[0] if hit else pool[-1]


def block_forward(x, params, *, n_heads=N_HEADS, compute_dtype=jnp.bfloat16):
    (g1, b1, wq, wk, wv, wp, bp, g2, b2, w1, bf1, w2, bf2) = params
    B, T, C = x.shape

    # Fuse Q/K/V into one (C, 3C) weight; fold 1/sqrt(n_embd) into the Q columns
    # (reference scales by 1/sqrt(C) with C = n_embd, not head_size).
    wqkv = jnp.concatenate([wq * (1.0 / math.sqrt(C)), wk, wv],
                           axis=1).astype(compute_dtype)
    wp_c = wp.astype(compute_dtype)
    w1_c = w1.astype(compute_dtype)
    w2_c = w2.astype(compute_dtype)

    bt = _pick_batch_tile(B, T)
    n_tiles = B // bt
    rows = bt * T

    x2 = x.reshape(B * T, C)

    full = lambda shape: pl.BlockSpec(shape, lambda i: (0,) * len(shape))
    in_specs = [
        pl.BlockSpec((rows, C), lambda i: (i, 0)),       # x rows (Bt*T, C)
        full((1, C)), full((1, C)),                      # ln1 gamma / beta
        full((C, 3 * C)),                                # fused Wqkv (Q pre-scaled)
        full((C, C)), full((1, C)),                      # Wproj, bproj
        full((1, C)), full((1, C)),                      # ln2 gamma / beta
        full((C, 4 * C)), full((1, 4 * C)),              # W1, b1
        full((4 * C, C)), full((1, C)),                  # W2, b2
    ]

    kernel = functools.partial(block_kernel, seq=T, n_heads=n_heads)
    out = pl.pallas_call(
        kernel,
        out_shape=jax.ShapeDtypeStruct((B * T, C), jnp.float32),
        grid_spec=pltpu.PrefetchScalarGridSpec(
            num_scalar_prefetch=0,
            grid=(n_tiles,),
            in_specs=in_specs,
            out_specs=pl.BlockSpec((rows, C), lambda i: (i, 0)),
        ),
        compiler_params=pltpu.CompilerParams(
            dimension_semantics=("parallel",)),   # shards batch tiles across TCs (v7x)
    )(x2, g1, b1, wqkv, wp_c, bp, g2, b2, w1_c, bf1, w2_c, bf2)
    return out.reshape(B, T, C)


def block_reference(x, params):
    """Pure-JAX reference replicating the PyTorch Block forward (fp32)."""
    (g1, b1, wq, wk, wv, wp, bp, g2, b2, w1, bf1, w2, bf2) = params
    B, T, C = x.shape
    hs = C // N_HEADS

    xn = _layer_norm(x, g1[0], b1[0])
    q = xn @ wq
    k = xn @ wk
    v = xn @ wv
    scale = 1.0 / math.sqrt(C)
    causal = jnp.tril(jnp.ones((T, T), dtype=bool))
    outs = []
    for h in range(N_HEADS):
        qh = q[..., h * hs:(h + 1) * hs]
        kh = k[..., h * hs:(h + 1) * hs]
        vh = v[..., h * hs:(h + 1) * hs]
        s = jnp.einsum("btd,bsd->bts", qh, kh) * scale
        s = jnp.where(causal, s, -jnp.inf)
        p = jax.nn.softmax(s, axis=-1)
        outs.append(jnp.einsum("bts,bsd->btd", p, vh))
    attn = jnp.concatenate(outs, axis=-1) @ wp + bp[0]
    x1 = x + attn
    xn2 = _layer_norm(x1, g2[0], b2[0])
    ffn = jnp.maximum(xn2 @ w1 + bf1[0], 0.0) @ w2 + bf2[0]
    return x1 + ffn


def init_params(key, C):
    ks = jax.random.split(key, 8)
    scale = 0.02
    g1 = jnp.ones((1, C), jnp.float32)
    b1 = jnp.zeros((1, C), jnp.float32)
    g2 = jnp.ones((1, C), jnp.float32)
    b2 = jnp.zeros((1, C), jnp.float32)
    wq = scale * jax.random.normal(ks[0], (C, C), jnp.float32)
    wk = scale * jax.random.normal(ks[1], (C, C), jnp.float32)
    wv = scale * jax.random.normal(ks[2], (C, C), jnp.float32)
    wp = scale * jax.random.normal(ks[3], (C, C), jnp.float32)
    bp = scale * jax.random.normal(ks[4], (1, C), jnp.float32)
    w1 = scale * jax.random.normal(ks[5], (C, 4 * C), jnp.float32)
    bf1 = jnp.zeros((1, 4 * C), jnp.float32)
    w2 = scale * jax.random.normal(ks[6], (4 * C, C), jnp.float32)
    bf2 = scale * jax.random.normal(ks[7], (1, C), jnp.float32)
    return (g1, b1, wq, wk, wv, wp, bp, g2, b2, w1, bf1, w2, bf2)


if __name__ == "__main__":
    key = jax.random.PRNGKey(0)
    kx, kp = jax.random.split(key)

    B, T, C = 2, 8, N_EMBD            # T <= block_size (32)
    x = jax.random.normal(kx, (B, T, C), jnp.float32)
    params = init_params(kp, C)

    ref = jax.block_until_ready(block_reference(x, params))

    # Exact-parity fp32 path (only deviation: EUP approx reciprocal in softmax).
    out_f32 = jax.block_until_ready(
        block_forward(x, params, compute_dtype=jnp.float32))
    assert out_f32.shape == (B, T, C)
    assert jnp.allclose(out_f32, ref, atol=1e-3, rtol=1e-3), \
        f"fp32 max err {jnp.max(jnp.abs(out_f32 - ref))}"

    # Default fast path: bf16 matmul operands, fp32 accumulation.
    # bf16 operand rounding (~2^-9 relative) on the 0.02-scale weight branches
    # bounds the output error well below 1e-2.
    out_bf16 = jax.block_until_ready(block_forward(x, params))
    assert out_bf16.shape == (B, T, C)
    assert jnp.allclose(out_bf16, ref, atol=1e-2, rtol=1e-2), \
        f"bf16 max err {jnp.max(jnp.abs(out_bf16 - ref))}"

    print("KERNEL_OK")
</pallas_src>

<mosaic_0001>
module attributes {stable_mosaic.version = 11 : i64} {
  func.func @block_kernel(%arg0: i32, %arg1: memref<8x64xf32, #tpu.memory_space<vmem>>, %arg2: memref<1x64xf32, #tpu.memory_space<vmem>>, %arg3: memref<1x64xf32, #tpu.memory_space<vmem>>, %arg4: memref<64x192xf32, #tpu.memory_space<vmem>>, %arg5: memref<64x64xf32, #tpu.memory_space<vmem>>, %arg6: memref<1x64xf32, #tpu.memory_space<vmem>>, %arg7: memref<1x64xf32, #tpu.memory_space<vmem>>, %arg8: memref<1x64xf32, #tpu.memory_space<vmem>>, %arg9: memref<64x256xf32, #tpu.memory_space<vmem>>, %arg10: memref<1x256xf32, #tpu.memory_space<vmem>>, %arg11: memref<256x64xf32, #tpu.memory_space<vmem>>, %arg12: memref<1x64xf32, #tpu.memory_space<vmem>>, %arg13: memref<8x64xf32, #tpu.memory_space<vmem>>) attributes {dimension_semantics = [#tpu.dimension_semantics<parallel>], iteration_bounds = array<i64: 2>, scalar_prefetch = 0 : i64, scratch_operands = 0 : i64, tpu.core_type = #tpu.core_type<tc>, window_params = [{transform_indices = @transform_0, window_bounds = array<i64: 8, 64>}, {pipeline_mode = #tpu.pipeline_mode<synchronous>, transform_indices = @transform_1, window_bounds = array<i64: 1, 64>}, {pipeline_mode = #tpu.pipeline_mode<synchronous>, transform_indices = @transform_2, window_bounds = array<i64: 1, 64>}, {pipeline_mode = #tpu.pipeline_mode<synchronous>, transform_indices = @transform_3, window_bounds = array<i64: 64, 192>}, {pipeline_mode = #tpu.pipeline_mode<synchronous>, transform_indices = @transform_4, window_bounds = array<i64: 64, 64>}, {pipeline_mode = #tpu.pipeline_mode<synchronous>, transform_indices = @transform_5, window_bounds = array<i64: 1, 64>}, {pipeline_mode = #tpu.pipeline_mode<synchronous>, transform_indices = @transform_6, window_bounds = array<i64: 1, 64>}, {pipeline_mode = #tpu.pipeline_mode<synchronous>, transform_indices = @transform_7, window_bounds = array<i64: 1, 64>}, {pipeline_mode = #tpu.pipeline_mode<synchronous>, transform_indices = @transform_8, window_bounds = array<i64: 64, 256>}, {pipeline_mode = #tpu.pipeline_mode<synchronous>, transform_indices = @transform_9, window_bounds = array<i64: 1, 256>}, {pipeline_mode = #tpu.pipeline_mode<synchronous>, transform_indices = @transform_10, window_bounds = array<i64: 256, 64>}, {pipeline_mode = #tpu.pipeline_mode<synchronous>, transform_indices = @transform_11, window_bounds = array<i64: 1, 64>}, {transform_indices = @transform_12, window_bounds = array<i64: 8, 64>}]} {
    %c0 = arith.constant 0 : index
    %c0_0 = arith.constant 0 : index
    %0 = vector.load %arg1[%c0, %c0_0] : memref<8x64xf32, #tpu.memory_space<vmem>>, vector<8x64xf32>
    %c0_1 = arith.constant 0 : index
    %c0_2 = arith.constant 0 : index
    %1 = vector.load %arg2[%c0_1, %c0_2] : memref<1x64xf32, #tpu.memory_space<vmem>>, vector<1x64xf32>
    %2 = vector.shape_cast %1 : vector<1x64xf32> to vector<64xf32>
    %c0_3 = arith.constant 0 : index
    %c0_4 = arith.constant 0 : index
    %3 = vector.load %arg3[%c0_3, %c0_4] : memref<1x64xf32, #tpu.memory_space<vmem>>, vector<1x64xf32>
    %4 = vector.shape_cast %3 : vector<1x64xf32> to vector<64xf32>
    %cst = arith.constant dense<0.000000e+00> : vector<8xf32>
    %5 = vector.multi_reduction <add>, %0, %cst [1] : vector<8x64xf32> to vector<8xf32>
    %6 = vector.shape_cast %5 : vector<8xf32> to vector<8x1xf32>
    %cst_5 = arith.constant 6.400000e+01 : f32
    %7 = vector.broadcast %cst_5 : f32 to vector<8x1xf32>
    %8 = arith.divf %6, %7 : vector<8x1xf32>
    %9 = vector.broadcast %8 : vector<8x1xf32> to vector<8x64xf32>
    %10 = arith.subf %0, %9 : vector<8x64xf32>
    %11 = arith.mulf %10, %10 : vector<8x64xf32>
    %cst_6 = arith.constant dense<0.000000e+00> : vector<8xf32>
    %12 = vector.multi_reduction <add>, %11, %cst_6 [1] : vector<8x64xf32> to vector<8xf32>
    %13 = vector.shape_cast %12 : vector<8xf32> to vector<8x1xf32>
    %cst_7 = arith.constant 6.400000e+01 : f32
    %14 = vector.broadcast %cst_7 : f32 to vector<8x1xf32>
    %15 = arith.divf %13, %14 : vector<8x1xf32>
    %16 = vector.broadcast %8 : vector<8x1xf32> to vector<8x64xf32>
    %17 = arith.subf %0, %16 : vector<8x64xf32>
    %cst_8 = arith.constant 9.99999974E-6 : f32
    %18 = vector.broadcast %cst_8 : f32 to vector<8x1xf32>
    %19 = arith.addf %15, %18 : vector<8x1xf32>
    %20 = math.rsqrt %19 : vector<8x1xf32>
    %21 = vector.broadcast %20 : vector<8x1xf32> to vector<8x64xf32>
    %22 = arith.mulf %17, %21 : vector<8x64xf32>
    %23 = vector.shape_cast %2 : vector<64xf32> to vector<1x64xf32>
    %24 = vector.broadcast %23 : vector<1x64xf32> to vector<8x64xf32>
    %25 = arith.mulf %22, %24 : vector<8x64xf32>
    %26 = vector.shape_cast %4 : vector<64xf32> to vector<1x64xf32>
    %27 = vector.broadcast %26 : vector<1x64xf32> to vector<8x64xf32>
    %28 = arith.addf %25, %27 : vector<8x64xf32>
    %c0_9 = arith.constant 0 : index
    %c0_10 = arith.constant 0 : index
    %29 = vector.load %arg4[%c0_9, %c0_10] : memref<64x192xf32, #tpu.memory_space<vmem>>, vector<64x192xf32>
    %cst_11 = arith.constant dense<0.000000e+00> : vector<8x192xf32>
    %30 = tpu.matmul %28, %29, %cst_11 {dimension_numbers = #tpu.dot_dimension_numbers<[1], [0], [0], [1], [0, 0, 1, 1], [], []>} : vector<8x64xf32>, vector<64x192xf32>, vector<8x192xf32> -> vector<8x192xf32>
    %31 = vector.shape_cast %30 : vector<8x192xf32> to vector<1x8x192xf32>
    %32 = tpu.iota {dimensions = array<i32: 0>} : vector<8x8xi32>
    %33 = tpu.iota {dimensions = array<i32: 1>} : vector<8x8xi32>
    %34 = arith.cmpi sge, %32, %33 : vector<8x8xi32>
    %cst_12 = arith.constant 0.000000e+00 : f32
    %cst_13 = arith.constant -1.000000e+30 : f32
    %35 = vector.broadcast %cst_12 : f32 to vector<8x8xf32>
    %36 = vector.broadcast %cst_13 : f32 to vector<8x8xf32>
    %37 = arith.select %34, %35, %36 : vector<8x8xi1>, vector<8x8xf32>
    %38 = tpu.iota {dimensions = array<i32: 2>} : vector<1x1x64xi32>
    %39 = vector.extract_strided_slice %31 {offsets = [0, 0, 128], sizes = [1, 8, 64], strides = [1, 1, 1]} : vector<1x8x192xf32> to vector<1x8x64xf32>
    %cst_14 = arith.constant 0.000000e+00 : f32
    %40 = vector.broadcast %cst_14 : f32 to vector<1x8x64xf32>
    %41 = vector.extract_strided_slice %31 {offsets = [0, 0, 0], sizes = [1, 8, 16], strides = [1, 1, 1]} : vector<1x8x192xf32> to vector<1x8x16xf32>
    %42 = vector.extract_strided_slice %31 {offsets = [0, 0, 64], sizes = [1, 8, 16], strides = [1, 1, 1]} : vector<1x8x192xf32> to vector<1x8x16xf32>
    "tpu.trace_start"() <{level = 10 : i32, message = "bqd,bkd->bqk"}> : () -> ()
    %cst_15 = arith.constant dense<0.000000e+00> : vector<1x8x8xf32>
    %43 = tpu.matmul %41, %42, %cst_15 {dimension_numbers = #tpu.dot_dimension_numbers<[2], [2], [1], [1], [0, 0, 0, 1, 1, 1], [0], [0]>} : vector<1x8x16xf32>, vector<1x8x16xf32>, vector<1x8x8xf32> -> vector<1x8x8xf32>
    "tpu.trace_stop"() : () -> ()
    %44 = vector.shape_cast %37 : vector<8x8xf32> to vector<1x8x8xf32>
    %45 = arith.addf %43, %44 : vector<1x8x8xf32>
    %cst_16 = arith.constant dense<0xFF800000> : vector<1x8xf32>
    %46 = vector.multi_reduction <maximumf>, %45, %cst_16 [2] : vector<1x8x8xf32> to vector<1x8xf32>
    %47 = vector.shape_cast %46 : vector<1x8xf32> to vector<1x8x1xf32>
    %48 = vector.broadcast %47 : vector<1x8x1xf32> to vector<1x8x8xf32>
    %49 = arith.subf %45, %48 : vector<1x8x8xf32>
    %50 = math.exp %49 : vector<1x8x8xf32>
    %cst_17 = arith.constant dense<0.000000e+00> : vector<1x8xf32>
    %51 = vector.multi_reduction <add>, %50, %cst_17 [2] : vector<1x8x8xf32> to vector<1x8xf32>
    %52 = vector.shape_cast %51 : vector<1x8xf32> to vector<1x8x1xf32>
    %53 = tpu.reciprocal %52 {approx = true} : vector<1x8x1xf32> -> vector<1x8x1xf32>
    %54 = vector.broadcast %53 : vector<1x8x1xf32> to vector<1x8x8xf32>
    %55 = arith.mulf %50, %54 : vector<1x8x8xf32>
    %c0_i32 = arith.constant 0 : i32
    %56 = vector.broadcast %c0_i32 : i32 to vector<1x1x64xi32>
    %57 = arith.cmpi sge, %38, %56 : vector<1x1x64xi32>
    %c16_i32 = arith.constant 16 : i32
    %58 = vector.broadcast %c16_i32 : i32 to vector<1x1x64xi32>
    %59 = arith.cmpi slt, %38, %58 : vector<1x1x64xi32>
    %60 = arith.andi %57, %59 : vector<1x1x64xi1>
    %61 = arith.extui %60 : vector<1x1x64xi1> to vector<1x1x64xi32>
    %62 = arith.sitofp %61 : vector<1x1x64xi32> to vector<1x1x64xf32>
    %63 = vector.broadcast %62 : vector<1x1x64xf32> to vector<1x8x64xf32>
    %64 = arith.mulf %39, %63 : vector<1x8x64xf32>
    "tpu.trace_start"() <{level = 10 : i32, message = "bqk,bkc->bqc"}> : () -> ()
    %cst_18 = arith.constant dense<0.000000e+00> : vector<1x8x64xf32>
    %65 = tpu.matmul %55, %64, %cst_18 {dimension_numbers = #tpu.dot_dimension_numbers<[2], [1], [1], [2], [0, 0, 0, 1, 1, 2], [0], [0]>} : vector<1x8x8xf32>, vector<1x8x64xf32>, vector<1x8x64xf32> -> vector<1x8x64xf32>
    "tpu.trace_stop"() : () -> ()
    %66 = arith.addf %40, %65 : vector<1x8x64xf32>
    %67 = vector.extract_strided_slice %31 {offsets = [0, 0, 16], sizes = [1, 8, 16], strides = [1, 1, 1]} : vector<1x8x192xf32> to vector<1x8x16xf32>
    %68 = vector.extract_strided_slice %31 {offsets = [0, 0, 80], sizes = [1, 8, 16], strides = [1, 1, 1]} : vector<1x8x192xf32> to vector<1x8x16xf32>
    "tpu.trace_start"() <{level = 10 : i32, message = "bqd,bkd->bqk"}> : () -> ()
    %cst_19 = arith.constant dense<0.000000e+00> : vector<1x8x8xf32>
    %69 = tpu.matmul %67, %68, %cst_19 {dimension_numbers = #tpu.dot_dimension_numbers<[2], [2], [1], [1], [0, 0, 0, 1, 1, 1], [0], [0]>} : vector<1x8x16xf32>, vector<1x8x16xf32>, vector<1x8x8xf32> -> vector<1x8x8xf32>
    "tpu.trace_stop"() : () -> ()
    %70 = vector.shape_cast %37 : vector<8x8xf32> to vector<1x8x8xf32>
    %71 = arith.addf %69, %70 : vector<1x8x8xf32>
    %cst_20 = arith.constant dense<0xFF800000> : vector<1x8xf32>
    %72 = vector.multi_reduction <maximumf>, %71, %cst_20 [2] : vector<1x8x8xf32> to vector<1x8xf32>
    %73 = vector.shape_cast %72 : vector<1x8xf32> to vector<1x8x1xf32>
    %74 = vector.broadcast %73 : vector<1x8x1xf32> to vector<1x8x8xf32>
    %75 = arith.subf %71, %74 : vector<1x8x8xf32>
    %76 = math.exp %75 : vector<1x8x8xf32>
    %cst_21 = arith.constant dense<0.000000e+00> : vector<1x8xf32>
    %77 = vector.multi_reduction <add>, %76, %cst_21 [2] : vector<1x8x8xf32> to vector<1x8xf32>
    %78 = vector.shape_cast %77 : vector<1x8xf32> to vector<1x8x1xf32>
    %79 = tpu.reciprocal %78 {approx = true} : vector<1x8x1xf32> -> vector<1x8x1xf32>
    %80 = vector.broadcast %79 : vector<1x8x1xf32> to vector<1x8x8xf32>
    %81 = arith.mulf %76, %80 : vector<1x8x8xf32>
    %c16_i32_22 = arith.constant 16 : i32
    %82 = vector.broadcast %c16_i32_22 : i32 to vector<1x1x64xi32>
    %83 = arith.cmpi sge, %38, %82 : vector<1x1x64xi32>
    %c32_i32 = arith.constant 32 : i32
    %84 = vector.broadcast %c32_i32 : i32 to vector<1x1x64xi32>
    %85 = arith.cmpi slt, %38, %84 : vector<1x1x64xi32>
    %86 = arith.andi %83, %85 : vector<1x1x64xi1>
    %87 = arith.extui %86 : vector<1x1x64xi1> to vector<1x1x64xi32>
    %88 = arith.sitofp %87 : vector<1x1x64xi32> to vector<1x1x64xf32>
    %89 = vector.broadcast %88 : vector<1x1x64xf32> to vector<1x8x64xf32>
    %90 = arith.mulf %39, %89 : vector<1x8x64xf32>
    "tpu.trace_start"() <{level = 10 : i32, message = "bqk,bkc->bqc"}> : () -> ()
    %cst_23 = arith.constant dense<0.000000e+00> : vector<1x8x64xf32>
    %91 = tpu.matmul %81, %90, %cst_23 {dimension_numbers = #tpu.dot_dimension_numbers<[2], [1], [1], [2], [0, 0, 0, 1, 1, 2], [0], [0]>} : vector<1x8x8xf32>, vector<1x8x64xf32>, vector<1x8x64xf32> -> vector<1x8x64xf32>
    "tpu.trace_stop"() : () -> ()
    %92 = arith.addf %66, %91 : vector<1x8x64xf32>
    %93 = vector.extract_strided_slice %31 {offsets = [0, 0, 32], sizes = [1, 8, 16], strides = [1, 1, 1]} : vector<1x8x192xf32> to vector<1x8x16xf32>
    %94 = vector.extract_strided_slice %31 {offsets = [0, 0, 96], sizes = [1, 8, 16], strides = [1, 1, 1]} : vector<1x8x192xf32> to vector<1x8x16xf32>
    "tpu.trace_start"() <{level = 10 : i32, message = "bqd,bkd->bqk"}> : () -> ()
    %cst_24 = arith.constant dense<0.000000e+00> : vector<1x8x8xf32>
    %95 = tpu.matmul %93, %94, %cst_24 {dimension_numbers = #tpu.dot_dimension_numbers<[2], [2], [1], [1], [0, 0, 0, 1, 1, 1], [0], [0]>} : vector<1x8x16xf32>, vector<1x8x16xf32>, vector<1x8x8xf32> -> vector<1x8x8xf32>
    "tpu.trace_stop"() : () -> ()
    %96 = vector.shape_cast %37 : vector<8x8xf32> to vector<1x8x8xf32>
    %97 = arith.addf %95, %96 : vector<1x8x8xf32>
    %cst_25 = arith.constant dense<0xFF800000> : vector<1x8xf32>
    %98 = vector.multi_reduction <maximumf>, %97, %cst_25 [2] : vector<1x8x8xf32> to vector<1x8xf32>
    %99 = vector.shape_cast %98 : vector<1x8xf32> to vector<1x8x1xf32>
    %100 = vector.broadcast %99 : vector<1x8x1xf32> to vector<1x8x8xf32>
    %101 = arith.subf %97, %100 : vector<1x8x8xf32>
    %102 = math.exp %101 : vector<1x8x8xf32>
    %cst_26 = arith.constant dense<0.000000e+00> : vector<1x8xf32>
    %103 = vector.multi_reduction <add>, %102, %cst_26 [2] : vector<1x8x8xf32> to vector<1x8xf32>
    %104 = vector.shape_cast %103 : vector<1x8xf32> to vector<1x8x1xf32>
    %105 = tpu.reciprocal %104 {approx = true} : vector<1x8x1xf32> -> vector<1x8x1xf32>
    %106 = vector.broadcast %105 : vector<1x8x1xf32> to vector<1x8x8xf32>
    %107 = arith.mulf %102, %106 : vector<1x8x8xf32>
    %c32_i32_27 = arith.constant 32 : i32
    %108 = vector.broadcast %c32_i32_27 : i32 to vector<1x1x64xi32>
    %109 = arith.cmpi sge, %38, %108 : vector<1x1x64xi32>
    %c48_i32 = arith.constant 48 : i32
    %110 = vector.broadcast %c48_i32 : i32 to vector<1x1x64xi32>
    %111 = arith.cmpi slt, %38, %110 : vector<1x1x64xi32>
    %112 = arith.andi %109, %111 : vector<1x1x64xi1>
    %113 = arith.extui %112 : vector<1x1x64xi1> to vector<1x1x64xi32>
    %114 = arith.sitofp %113 : vector<1x1x64xi32> to vector<1x1x64xf32>
    %115 = vector.broadcast %114 : vector<1x1x64xf32> to vector<1x8x64xf32>
    %116 = arith.mulf %39, %115 : vector<1x8x64xf32>
    "tpu.trace_start"() <{level = 10 : i32, message = "bqk,bkc->bqc"}> : () -> ()
    %cst_28 = arith.constant dense<0.000000e+00> : vector<1x8x64xf32>
    %117 = tpu.matmul %107, %116, %cst_28 {dimension_numbers = #tpu.dot_dimension_numbers<[2], [1], [1], [2], [0, 0, 0, 1, 1, 2], [0], [0]>} : vector<1x8x8xf32>, vector<1x8x64xf32>, vector<1x8x64xf32> -> vector<1x8x64xf32>
    "tpu.trace_stop"() : () -> ()
    %118 = arith.addf %92, %117 : vector<1x8x64xf32>
    %119 = vector.extract_strided_slice %31 {offsets = [0, 0, 48], sizes = [1, 8, 16], strides = [1, 1, 1]} : vector<1x8x192xf32> to vector<1x8x16xf32>
    %120 = vector.extract_strided_slice %31 {offsets = [0, 0, 112], sizes = [1, 8, 16], strides = [1, 1, 1]} : vector<1x8x192xf32> to vector<1x8x16xf32>
    "tpu.trace_start"() <{level = 10 : i32, message = "bqd,bkd->bqk"}> : () -> ()
    %cst_29 = arith.constant dense<0.000000e+00> : vector<1x8x8xf32>
    %121 = tpu.matmul %119, %120, %cst_29 {dimension_numbers = #tpu.dot_dimension_numbers<[2], [2], [1], [1], [0, 0, 0, 1, 1, 1], [0], [0]>} : vector<1x8x16xf32>, vector<1x8x16xf32>, vector<1x8x8xf32> -> vector<1x8x8xf32>
    "tpu.trace_stop"() : () -> ()
    %122 = vector.shape_cast %37 : vector<8x8xf32> to vector<1x8x8xf32>
    %123 = arith.addf %121, %122 : vector<1x8x8xf32>
    %cst_30 = arith.constant dense<0xFF800000> : vector<1x8xf32>
    %124 = vector.multi_reduction <maximumf>, %123, %cst_30 [2] : vector<1x8x8xf32> to vector<1x8xf32>
    %125 = vector.shape_cast %124 : vector<1x8xf32> to vector<1x8x1xf32>
    %126 = vector.broadcast %125 : vector<1x8x1xf32> to vector<1x8x8xf32>
    %127 = arith.subf %123, %126 : vector<1x8x8xf32>
    %128 = math.exp %127 : vector<1x8x8xf32>
    %cst_31 = arith.constant dense<0.000000e+00> : vector<1x8xf32>
    %129 = vector.multi_reduction <add>, %128, %cst_31 [2] : vector<1x8x8xf32> to vector<1x8xf32>
    %130 = vector.shape_cast %129 : vector<1x8xf32> to vector<1x8x1xf32>
    %131 = tpu.reciprocal %130 {approx = true} : vector<1x8x1xf32> -> vector<1x8x1xf32>
    %132 = vector.broadcast %131 : vector<1x8x1xf32> to vector<1x8x8xf32>
    %133 = arith.mulf %128, %132 : vector<1x8x8xf32>
    %c48_i32_32 = arith.constant 48 : i32
    %134 = vector.broadcast %c48_i32_32 : i32 to vector<1x1x64xi32>
    %135 = arith.cmpi sge, %38, %134 : vector<1x1x64xi32>
    %c64_i32 = arith.constant 64 : i32
    %136 = vector.broadcast %c64_i32 : i32 to vector<1x1x64xi32>
    %137 = arith.cmpi slt, %38, %136 : vector<1x1x64xi32>
    %138 = arith.andi %135, %137 : vector<1x1x64xi1>
    %139 = arith.extui %138 : vector<1x1x64xi1> to vector<1x1x64xi32>
    %140 = arith.sitofp %139 : vector<1x1x64xi32> to vector<1x1x64xf32>
    %141 = vector.broadcast %140 : vector<1x1x64xf32> to vector<1x8x64xf32>
    %142 = arith.mulf %39, %141 : vector<1x8x64xf32>
    "tpu.trace_start"() <{level = 10 : i32, message = "bqk,bkc->bqc"}> : () -> ()
    %cst_33 = arith.constant dense<0.000000e+00> : vector<1x8x64xf32>
    %143 = tpu.matmul %133, %142, %cst_33 {dimension_numbers = #tpu.dot_dimension_numbers<[2], [1], [1], [2], [0, 0, 0, 1, 1, 2], [0], [0]>} : vector<1x8x8xf32>, vector<1x8x64xf32>, vector<1x8x64xf32> -> vector<1x8x64xf32>
    "tpu.trace_stop"() : () -> ()
    %144 = arith.addf %118, %143 : vector<1x8x64xf32>
    %145 = vector.shape_cast %144 : vector<1x8x64xf32> to vector<8x64xf32>
    %c0_34 = arith.constant 0 : index
    %c0_35 = arith.constant 0 : index
    %146 = vector.load %arg5[%c0_34, %c0_35] : memref<64x64xf32, #tpu.memory_space<vmem>>, vector<64x64xf32>
    %cst_36 = arith.constant dense<0.000000e+00> : vector<8x64xf32>
    %147 = tpu.matmul %145, %146, %cst_36 {dimension_numbers = #tpu.dot_dimension_numbers<[1], [0], [0], [1], [0, 0, 1, 1], [], []>} : vector<8x64xf32>, vector<64x64xf32>, vector<8x64xf32> -> vector<8x64xf32>
    %c0_37 = arith.constant 0 : index
    %c0_38 = arith.constant 0 : index
    %148 = vector.load %arg6[%c0_37, %c0_38] : memref<1x64xf32, #tpu.memory_space<vmem>>, vector<1x64xf32>
    %149 = vector.shape_cast %148 : vector<1x64xf32> to vector<64xf32>
    %150 = vector.shape_cast %149 : vector<64xf32> to vector<1x64xf32>
    %151 = vector.broadcast %150 : vector<1x64xf32> to vector<8x64xf32>
    %152 = arith.addf %147, %151 : vector<8x64xf32>
    %153 = arith.addf %0, %152 : vector<8x64xf32>
    %c0_39 = arith.constant 0 : index
    %c0_40 = arith.constant 0 : index
    %154 = vector.load %arg7[%c0_39, %c0_40] : memref<1x64xf32, #tpu.memory_space<vmem>>, vector<1x64xf32>
    %155 = vector.shape_cast %154 : vector<1x64xf32> to vector<64xf32>
    %c0_41 = arith.constant 0 : index
    %c0_42 = arith.constant 0 : index
    %156 = vector.load %arg8[%c0_41, %c0_42] : memref<1x64xf32, #tpu.memory_space<vmem>>, vector<1x64xf32>
    %157 = vector.shape_cast %156 : vector<1x64xf32> to vector<64xf32>
    %cst_43 = arith.constant dense<0.000000e+00> : vector<8xf32>
    %158 = vector.multi_reduction <add>, %153, %cst_43 [1] : vector<8x64xf32> to vector<8xf32>
    %159 = vector.shape_cast %158 : vector<8xf32> to vector<8x1xf32>
    %cst_44 = arith.constant 6.400000e+01 : f32
    %160 = vector.broadcast %cst_44 : f32 to vector<8x1xf32>
    %161 = arith.divf %159, %160 : vector<8x1xf32>
    %162 = vector.broadcast %161 : vector<8x1xf32> to vector<8x64xf32>
    %163 = arith.subf %153, %162 : vector<8x64xf32>
    %164 = arith.mulf %163, %163 : vector<8x64xf32>
    %cst_45 = arith.constant dense<0.000000e+00> : vector<8xf32>
    %165 = vector.multi_reduction <add>, %164, %cst_45 [1] : vector<8x64xf32> to vector<8xf32>
    %166 = vector.shape_cast %165 : vector<8xf32> to vector<8x1xf32>
    %cst_46 = arith.constant 6.400000e+01 : f32
    %167 = vector.broadcast %cst_46 : f32 to vector<8x1xf32>
    %168 = arith.divf %166, %167 : vector<8x1xf32>
    %169 = vector.broadcast %161 : vector<8x1xf32> to vector<8x64xf32>
    %170 = arith.subf %153, %169 : vector<8x64xf32>
    %cst_47 = arith.constant 9.99999974E-6 : f32
    %171 = vector.broadcast %cst_47 : f32 to vector<8x1xf32>
    %172 = arith.addf %168, %171 : vector<8x1xf32>
    %173 = math.rsqrt %172 : vector<8x1xf32>
    %174 = vector.broadcast %173 : vector<8x1xf32> to vector<8x64xf32>
    %175 = arith.mulf %170, %174 : vector<8x64xf32>
    %176 = vector.shape_cast %155 : vector<64xf32> to vector<1x64xf32>
    %177 = vector.broadcast %176 : vector<1x64xf32> to vector<8x64xf32>
    %178 = arith.mulf %175, %177 : vector<8x64xf32>
    %179 = vector.shape_cast %157 : vector<64xf32> to vector<1x64xf32>
    %180 = vector.broadcast %179 : vector<1x64xf32> to vector<8x64xf32>
    %181 = arith.addf %178, %180 : vector<8x64xf32>
    %c0_48 = arith.constant 0 : index
    %c0_49 = arith.constant 0 : index
    %182 = vector.load %arg9[%c0_48, %c0_49] : memref<64x256xf32, #tpu.memory_space<vmem>>, vector<64x256xf32>
    %cst_50 = arith.constant dense<0.000000e+00> : vector<8x256xf32>
    %183 = tpu.matmul %181, %182, %cst_50 {dimension_numbers = #tpu.dot_dimension_numbers<[1], [0], [0], [1], [0, 0, 1, 1], [], []>} : vector<8x64xf32>, vector<64x256xf32>, vector<8x256xf32> -> vector<8x256xf32>
    %c0_51 = arith.constant 0 : index
    %c0_52 = arith.constant 0 : index
    %184 = vector.load %arg10[%c0_51, %c0_52] : memref<1x256xf32, #tpu.memory_space<vmem>>, vector<1x256xf32>
    %185 = vector.shape_cast %184 : vector<1x256xf32> to vector<256xf32>
    %186 = vector.shape_cast %185 : vector<256xf32> to vector<1x256xf32>
    %187 = vector.broadcast %186 : vector<1x256xf32> to vector<8x256xf32>
    %188 = arith.addf %183, %187 : vector<8x256xf32>
    %cst_53 = arith.constant 0.000000e+00 : f32
    %189 = vector.broadcast %cst_53 : f32 to vector<8x256xf32>
    %190 = arith.maximumf %188, %189 : vector<8x256xf32>
    %c0_54 = arith.constant 0 : index
    %c0_55 = arith.constant 0 : index
    %191 = vector.load %arg11[%c0_54, %c0_55] : memref<256x64xf32, #tpu.memory_space<vmem>>, vector<256x64xf32>
    %cst_56 = arith.constant dense<0.000000e+00> : vector<8x64xf32>
    %192 = tpu.matmul %190, %191, %cst_56 {dimension_numbers = #tpu.dot_dimension_numbers<[1], [0], [0], [1], [0, 0, 1, 1], [], []>} : vector<8x256xf32>, vector<256x64xf32>, vector<8x64xf32> -> vector<8x64xf32>
    %c0_57 = arith.constant 0 : index
    %c0_58 = arith.constant 0 : index
    %193 = vector.load %arg12[%c0_57, %c0_58] : memref<1x64xf32, #tpu.memory_space<vmem>>, vector<1x64xf32>
    %194 = vector.shape_cast %193 : vector<1x64xf32> to vector<64xf32>
    %195 = vector.shape_cast %194 : vector<64xf32> to vector<1x64xf32>
    %196 = vector.broadcast %195 : vector<1x64xf32> to vector<8x64xf32>
    %197 = arith.addf %192, %196 : vector<8x64xf32>
    %198 = arith.addf %153, %197 : vector<8x64xf32>
    %c0_59 = arith.constant 0 : index
    %c0_60 = arith.constant 0 : index
    %199 = vector.load %arg13[%c0_59, %c0_60] : memref<8x64xf32, #tpu.memory_space<vmem>>, vector<8x64xf32>
    tpu.vector_store %arg13[%c0_59, %c0_60], %198 {strides = array<i32>} : memref<8x64xf32, #tpu.memory_space<vmem>>, vector<8x64xf32>,
    return
  }
  func.func @transform_0(%arg0: i32) -> (i32, i32) {
    %c0_i32 = arith.constant 0 : i32
    %c0_i32_0 = arith.constant 0 : i32
    return %arg0, %c0_i32 : i32, i32
  }
  func.func @transform_1(%arg0: i32) -> (i32, i32) {
    %c0_i32 = arith.constant 0 : i32
    %c0_i32_0 = arith.constant 0 : i32
    %c0_i32_1 = arith.constant 0 : i32
    return %c0_i32, %c0_i32_0 : i32, i32
  }
  func.func @transform_2(%arg0: i32) -> (i32, i32) {
    %c0_i32 = arith.constant 0 : i32
    %c0_i32_0 = arith.constant 0 : i32
    %c0_i32_1 = arith.constant 0 : i32
    return %c0_i32, %c0_i32_0 : i32, i32
  }
  func.func @transform_3(%arg0: i32) -> (i32, i32) {
    %c0_i32 = arith.constant 0 : i32
    %c0_i32_0 = arith.constant 0 : i32
    %c0_i32_1 = arith.constant 0 : i32
    return %c0_i32, %c0_i32_0 : i32, i32
  }
  func.func @transform_4(%arg0: i32) -> (i32, i32) {
    %c0_i32 = arith.constant 0 : i32
    %c0_i32_0 = arith.constant 0 : i32
    %c0_i32_1 = arith.constant 0 : i32
    return %c0_i32, %c0_i32_0 : i32, i32
  }
  func.func @transform_5(%arg0: i32) -> (i32, i32) {
    %c0_i32 = arith.constant 0 : i32
    %c0_i32_0 = arith.constant 0 : i32
    %c0_i32_1 = arith.constant 0 : i32
    return %c0_i32, %c0_i32_0 : i32, i32
  }
  func.func @transform_6(%arg0: i32) -> (i32, i32) {
    %c0_i32 = arith.constant 0 : i32
    %c0_i32_0 = arith.constant 0 : i32
    %c0_i32_1 = arith.constant 0 : i32
    return %c0_i32, %c0_i32_0 : i32, i32
  }
  func.func @transform_7(%arg0: i32) -> (i32, i32) {
    %c0_i32 = arith.constant 0 : i32
    %c0_i32_0 = arith.constant 0 : i32
    %c0_i32_1 = arith.constant 0 : i32
    return %c0_i32, %c0_i32_0 : i32, i32
  }
  func.func @transform_8(%arg0: i32) -> (i32, i32) {
    %c0_i32 = arith.constant 0 : i32
    %c0_i32_0 = arith.constant 0 : i32
    %c0_i32_1 = arith.constant 0 : i32
    return %c0_i32, %c0_i32_0 : i32, i32
  }
  func.func @transform_9(%arg0: i32) -> (i32, i32) {
    %c0_i32 = arith.constant 0 : i32
    %c0_i32_0 = arith.constant 0 : i32
    %c0_i32_1 = arith.constant 0 : i32
    return %c0_i32, %c0_i32_0 : i32, i32
  }
  func.func @transform_10(%arg0: i32) -> (i32, i32) {
    %c0_i32 = arith.constant 0 : i32
    %c0_i32_0 = arith.constant 0 : i32
    %c0_i32_1 = arith.constant 0 : i32
    return %c0_i32, %c0_i32_0 : i32, i32
  }
  func.func @transform_11(%arg0: i32) -> (i32, i32) {
    %c0_i32 = arith.constant 0 : i32
    %c0_i32_0 = arith.constant 0 : i32
    %c0_i32_1 = arith.constant 0 : i32
    return %c0_i32, %c0_i32_0 : i32, i32
  }
  func.func @transform_12(%arg0: i32) -> (i32, i32) {
    %c0_i32 = arith.constant 0 : i32
    %c0_i32_0 = arith.constant 0 : i32
    return %arg0, %c0_i32 : i32, i32
  }
}

</mosaic_0001>

<bundles_post_ra>
// kernel: tpu_custom_call.1
= control target key start
LH: loop header
LB: loop body
LE: loop exit
PB: predicated region body
PF: predicated region fallthrough
CT: control target
= control target key end

     0   :  { %s2502_s0 = inlined_call_operand.vmem [shape: f32[16,64], index: 0, kind: input, shape index: {}]   ;;  %s2503_s1 = inlined_call_operand.vmem [shape: f32[1,64], index: 1, kind: input, shape index: {}]   ;;  %s2504_s2 = inlined_call_operand.vmem [shape: f32[1,64], index: 2, kind: input, shape index: {}]   ;;  %s2505_s3 = inlined_call_operand.vmem [shape: f32[64,192], index: 3, kind: input, shape index: {}]   ;;  %s2506_s4 = inlined_call_operand.vmem [shape: f32[64,64], index: 4, kind: input, shape index: {}]   ;;  %s2507_s5 = inlined_call_operand.vmem [shape: f32[1,64], index: 5, kind: input, shape index: {}]   ;;  %s2508_s6 = inlined_call_operand.vmem [shape: f32[1,64], index: 6, kind: input, shape index: {}]   ;;  %s2509_s7 = inlined_call_operand.vmem [shape: f32[1,64], index: 7, kind: input, shape index: {}]   ;;  %s2510_s8 = inlined_call_operand.vmem [shape: f32[64,256], index: 8, kind: input, shape index: {}]   ;;  %s2511_s9 = inlined_call_operand.vmem [shape: f32[1,256], index: 9, kind: input, shape index: {}]   ;;  %s2512_s10 = inlined_call_operand.vmem [shape: f32[256,64], index: 10, kind: input, shape index: {}]   ;;  %s2513_s11 = inlined_call_operand.vmem [shape: f32[1,64], index: 11, kind: input, shape index: {}]   ;;  %s2514_s12 = inlined_call_operand.hbm [shape: f32[16,64], index: 12, kind: output, shape index: {}]  }
   0x1   :  { %2515 = sst [smem:[#allocation5_spill]] %s2502_s0 }
   0x2   :  { %2516 = sst [smem:[#allocation6_spill]] %s2503_s1 }
   0x3   :  { %17 = vsyncpa [#allocation3], 0 }
   0x4   :  { %19 = vsyncpa [#allocation3 + $0x1], 0  ;;  %s2065_s21 = smov 0   ;;  %s2067_s22 = smov 0  }
   0x5   :  { %s2069_s23 = smov 0   ;;  %s2071_s24 = smov 0  }
   0x6 LB: > { %s2086_s25 = sadd.s32 4294967295, %s1986_s24   ;;  %s1618_s26 = sadd.s32 4294967294, %s1986_s24   ;;  %s1986_s24 = sphi %s2071_s24, %s2524_s24   ;;  %s1982_s23 = sphi %s2069_s23, %s2523_s23   ;;  %s1978_s22 = sphi %s2067_s22, %s2522_s22   ;;  %s1974_s21 = sphi %s2065_s21, %s2521_s21  }
   0x7   : > { %s2090_s27 = sadd.s32 1, %s1986_s24   ;;  %s289_s28 = sadd.s32 1, %s1982_s23 }
   0x8   : > { %s286_s29 = ssub.s32 %s1986_s24, %s2090_s27  ;;  %p299_p0 = scmp.ne.s32.totalorder %s1982_s23, %s1978_s22 }
   0x9   : > { %p287_p1 = scmp.eq.s32.totalorder %s286_s29, 0  ;;  %p300_p2 = scmp.eq.s32.totalorder %s2086_s25, 1 }
   0xa   : > { %p305_p3 = scmp.ne.s32.totalorder %s1978_s22, %s1974_s21  ;;  %p306_p4 = scmp.eq.s32.totalorder %s1618_s26, 1 }
   0xb   : > { %s2101_s30 = scalar_select %p287_p1, %s1982_s23, %s289_s28  }
   0xc   : > { %p2103_p5 = por %p300_p2, %p299_p0  ;;  %p2107_p6 = por %p306_p4, %p305_p3 }
   0xd   : > { %p1621_p7 = scmp.ge.s32.totalorder %s1986_s24, 1  ;;  %p364_p8 = scmp.lt.s32.totalorder %s1986_s24, 3 }
   0xf   : > { %p365_p9 = pnand %p1621_p7, %p364_p8 }
  0x10   : > { %p405_p10 = scmp.lt.s32.totalorder (!%p365_p9), %s2086_s25, 1  ;;  %vm412_vm0 = vcmask (!%p365_p9), 523264   ;;  %s2519_s0 = sld [smem:[#allocation5_spill]] (!%p365_p9)  ;;  %v442_v7 = vld [vmem:[%s2505_s3 + $0x8] sm:$0xff] (!%p365_p9)  ;;  %v444_v8 = vld [vmem:[%s2505_s3 + $0x18] sm:$0xff] (!%p365_p9)  ;;  %v441_v10 = vld [vmem:[%s2505_s3] sm:$0xff] (!%p365_p9)  ;;  %v531_v43 = vlaneseq (!%p365_p9) }
  0x11   : > { %368 = sbr.rel (%p365_p9) target bundleno = 2420 (0x974), region = 68  ;;  %v1772_v9 = vpack.c.bf16 (!%p365_p9), %v444_v8, %v442_v7  ;;  %v443_v11 = vld [vmem:[%s2505_s3 + $0x10] sm:$0xff] (!%p365_p9)  ;;  %v446_v13 = vld [vmem:[%s2505_s3 + $0x28] sm:$0xff] (!%p365_p9)  ;;  %v448_v14 = vld [vmem:[%s2505_s3 + $0x38] sm:$0xff] (!%p365_p9)  ;;  %v1988_v20 = vmov (!%p365_p9), 0.0   ;;  %s2520_s1 = sld [smem:[#allocation6_spill]] (!%p365_p9) }
  0x12   : > { %v1774_v12 = vpack.c.bf16 (!%p365_p9), %v443_v11, %v441_v10  ;;  %v445_v15 = vld [vmem:[%s2505_s3 + $0x20] sm:$0xff] (!%p365_p9)  ;;  %v1776_v16 = vpack.c.bf16 (!%p365_p9), %v448_v14, %v446_v13  ;;  %v447_v17 = vld [vmem:[%s2505_s3 + $0x30] sm:$0xff] (!%p365_p9)  ;;  %v450_v18 = vld [vmem:[%s2505_s3 + $0x48] sm:$0xff] (!%p365_p9)  ;;  %524 = vmatprep.mubr.f32.mxu1 (!%p365_p9), %v1988_v20  ;;  %1733 = vmatprep.subr.mxu0 (!%p365_p9), %v1988_v20  ;;  %vm1989_vm1 = vmmov (!%p365_p9), 0   ;;  %s1990_s17 = smov (!%p365_p9), 112   ;;  %s1991_s18 = smov (!%p365_p9), 64  }
  0x13   : > { %1773 = vmatprep.subr.bf16.mxu1 (!%p365_p9), %v1772_v9  ;;  %v452_v19 = vld [vmem:[%s2505_s3 + $0x58] sm:$0xff] (!%p365_p9)  ;;  %v1778_v21 = vpack.c.bf16 (!%p365_p9), %v447_v17, %v445_v15  ;;  %v449_v23 = vld [vmem:[%s2505_s3 + $0x40] sm:$0xff] (!%p365_p9)  ;;  %v451_v24 = vld [vmem:[%s2505_s3 + $0x50] sm:$0xff] (!%p365_p9)  ;;  %1735 = vmatprep.mubr.msk.f32.mxu0 (!%p365_p9), %vm1989_vm1, %v1988_v20  ;;  %s1994_s20 = smov (!%p365_p9), 96   ;;  %s1995_s26 = smov (!%p365_p9), 16   ;;  %v2188_v44 = vand.u32 (!%p365_p9), 127, %v531_v43 }
  0x14   : > { %1775 = vmatpush1.bf16.msra.mxu1 (!%p365_p9), %v1774_v12  ;;  %v1780_v22 = vpack.c.bf16 (!%p365_p9), %v452_v19, %v450_v18  ;;  %v454_v25 = vld [vmem:[%s2505_s3 + $0x68] sm:$0xff] (!%p365_p9)  ;;  %v456_v26 = vld [vmem:[%s2505_s3 + $0x78] sm:$0xff] (!%p365_p9)  ;;  %v1782_v27 = vpack.c.bf16 (!%p365_p9), %v451_v24, %v449_v23  ;;  %v453_v29 = vld [vmem:[%s2505_s3 + $0x60] sm:$0xff] (!%p365_p9)  ;;  %s1996_s28 = smov (!%p365_p9), 80   ;;  %vm540_vm4 = vcmask (!%p365_p9), 130048   ;;  %v2214_v54 = vshrl.u32 (!%p365_p9), %v531_v43, 7 }
  0x15   : > { %1777 = vmatprep.subr.bf16.mxu1 (!%p365_p9), %v1776_v16  ;;  %v1784_v28 = vpack.c.bf16 (!%p365_p9), %v456_v26, %v454_v25  ;;  %v455_v30 = vld [vmem:[%s2505_s3 + $0x70] sm:$0xff] (!%p365_p9)  ;;  %v1625_v38 = vld [vmem:[%s2504_s2] ss:$0 sm:$0xff] (!%p365_p9)  ;;  %vm722_vm2 = vcmp.ge.s32.totalorder (!%p365_p9), %v2188_v44, 16  ;;  %vm723_vm3 = vcmp.lt.s32.totalorder (!%p365_p9), %v2188_v44, 32  ;;  %vm615_vm7 = vcmask (!%p365_p9), 64512  }
  0x16   : > { %v1786_v31 = vpack.c.bf16 (!%p365_p9), %v455_v30, %v453_v29  ;;  %vm724_vm5 = vmand (!%p365_p9), %vm722_vm2, %vm723_vm3  ;;  %vm535_vm6 = vcmp.ge.s32.totalorder (!%p365_p9), %v2214_v54, %v2188_v44  ;;  %v1997_v55 = vmov (!%p365_p9), -1e+30   ;;  %v1219_v43 = vld [vmem:[%s2506_s4 + $0x38] sm:$0xff] (!%p365_p9)  ;;  %vm628_vm8 = vcmp.lt.s32.totalorder (!%p365_p9), %v2188_v44, 16 }
  0x17   : > { %v1624_v36 = vld [vmem:[%s2520_s1] ss:$0 sm:$0xff] (!%p365_p9)  ;;  %v1632_v46 = vsel (!%p365_p9), %vm724_vm5, 1.0, %v1988_v20  ;;  %v536_v56 = vsel (!%p365_p9), %vm535_vm6, 0.0, %v1997_v55  ;;  %vm963_vm9 = vcmp.ge.s32.totalorder (!%p365_p9), %v2188_v44, 32  ;;  %vm964_vm10 = vcmp.lt.s32.totalorder (!%p365_p9), %v2188_v44, 48 }
  0x18   : > { %s406_s15 = scalar_select %p405_p10, %s2086_s25, 1  ;;  %1779 = vmatpush1.bf16.msra.mxu1 %v1778_v21  ;;  %vm965_vm11 = vmand %vm963_vm9, %vm964_vm10  ;;  %vm1132_vm12 = vcmp.ge.s32.totalorder %v2188_v44, 48  ;;  %vm1133_vm13 = vcmp.lt.s32.totalorder %v2188_v44, 64 }
  0x19   : > { %1781 = vmatprep.subr.bf16.mxu1 %v1780_v22  ;;  %v1637_v55 = vsel %vm965_vm11, 1.0, %v1988_v20  ;;  %vm1134_vm14 = vmand %vm1132_vm12, %vm1133_vm13 }
  0x1a   : > { %s1623_s16 = sshll.u32 %s406_s15, 3 }
  0x1b   : > { %s408_s19 = scalar_lea.vmem %s2519_s0, %s1623_s16  ;;  %s1992_s0 = smov 48  }
  0x1c   : > { %v2118_v0 = vld [vmem:[%s408_s19] sm:$0xff]  ;;  %1783 = vmatpush1.bf16.msra.mxu1 %v1782_v27  ;;  %s1993_s19 = smov 32  }
  0x1d   : > { %v413_v1 = vsel %vm412_vm0, %v2118_v0, 0.0  ;;  %1785 = vmatprep.subr.bf16.mxu1 %v1784_v28 }
  0x1e   : > { %414 = vadd.xlane.f32.xlu0 %v413_v1 }
  0x20   : > { %1787 = vmatpush1.bf16.msra.mxu1 %v1786_v31  ;;  %v1212_v31 = vld [vmem:[%s2506_s4] sm:$0xff] }
  0x21   : > { %1713 = vmatprep.subr.mxu1 %v1988_v20 }
  0xab   : > { %v415_v2 = vpop.xlane.xlu0 %414 }
  0xac   : > { %v417_v3 = vmul.f32 0.015625, %v415_v2 }
  0xae   : > { %v418_v4 = vsub.f32 %v2118_v0, %v417_v3 }
  0xb0   : > { %v419_v5 = vmul.f32 %v418_v4, %v418_v4 }
  0xb2   : > { %v420_v6 = vsel %vm412_vm0, %v419_v5, 0.0 }
  0xb3   : > { %421 = vadd.xlane.f32.xlu0 %v420_v6 }
 0x140   : > { %v422_v32 = vpop.xlane.xlu0 %421 }
 0x141   : > { %v423_v33 = vmul.f32 0.015625, %v422_v32  ;;  %v1213_v32 = vld [vmem:[%s2506_s4 + $0x8] sm:$0xff] }
 0x143   : > { %v424_v34 = vadd.f32 1e-05, %v423_v33  ;;  %v1214_v33 = vld [vmem:[%s2506_s4 + $0x10] sm:$0xff] }
 0x145   : > { %1904 = vrsqrt.f32 %v424_v34  ;;  %v1998_v34 = vmov 0.0|0.0  }
 0x14f   : > { %v1905_v35 = vpop.eup %1904 }
 0x150   : > { %v426_v37 = vmul.f32 %v1905_v35, %v418_v4  ;;  %v1789_v35 = vpack.c.bf16 %v1213_v32, %v1212_v31  ;;  %v1345_v31 = vld [vmem:[%s2510_s8 + $0x78] sm:$0xff] }
 0x152   : > { %v433_v39 = vmul.f32 %v1624_v36, %v426_v37  ;;  %v1215_v36 = vld [vmem:[%s2506_s4 + $0x18] sm:$0xff] }
 0x153   : > { %v1792_v37 = vpack.c.bf16 %v1215_v36, %v1214_v33  ;;  %v1342_v33 = vld [vmem:[%s2510_s8 + $0x60] sm:$0xff] }
 0x154   : > { %v440_v40 = vadd.f32 %v1625_v38, %v433_v39  ;;  %v1216_v38 = vld [vmem:[%s2506_s4 + $0x20] sm:$0xff]  ;;  %v1217_v39 = vld [vmem:[%s2506_s4 + $0x28] sm:$0xff] }
 0x155   : > { %v1450_v36 = vld [vmem:[%s2512_s10 + $0x80] sm:$0xff] }
 0x156   : > { %1626 = vmatmul.mubr.msk.f32.vlgmr.msra.gmra.mrb[0].mxu1 %vm412_vm0, %v440_v40  ;;  %v1795_v40 = vpack.c.bf16 %v1217_v39, %v1216_v38  ;;  %v1434_v38 = vld [vmem:[%s2512_s10] sm:$0xff] }
 0x157   : > { %1715 = vmatprep.mubr.msk.f32.mxu1 %vm1989_vm1, %v1988_v20 }
 0x229   : > { %v526_v41 = vpop.f32.mrb[0].mxu1 }
 0x22a   : > { %633 = vrot.lane.b32.xlu0 %v526_v41, %s1990_s17  ;;  %538 = vrot.lane.b32.xlu1 %v526_v41, %s1991_s18  ;;  %v2186_v42 = vpop.f32.mrb[1].mxu1  ;;  %s402_s18 = sand.u32 1, %s1978_s22  }
 0x22b   : > { %v727_v48 = vmul.f32 %v1632_v46, %v2186_v42  ;;  %s1546_s17 = scalar_lea.sflag [#allocation3], %s402_s18 }
 0x22e   : > { %635 = vrot.lane.b32.xlu1 %v526_v41, %s1992_s0  ;;  %s1622_s0 = sshll.u32 %s402_s18, 3 }
 0x22f   : > { %s404_s1 = scalar_lea.vmem [#allocation2], %s1622_s0 }
 0x232   : > { %876 = vrot.lane.b32.xlu1 %v526_v41, %s1993_s19 }
 0x236   : > { %874 = vrot.lane.b32.xlu1 %v526_v41, %s1994_s20 }
 0x23a   : > { %1045 = vrot.lane.b32.xlu1 %v526_v41, %s1995_s26  ;;  %s1650_s26 = sshll.u32 %s2086_s25, 7  ;;  %s1999_s25 = smov [#allocation2]  }
 0x23b   : > { %s2459_s16 = scalar_lea.hbm %s2514_s12, %s1650_s26  ;;  %s1928_s0 = sshll.u32 %s1999_s25, 4  ;;  %s1929_s0 = int_to_ptr.vmem [resolvable:$false] %s1928_s0 }
 0x23c   : > { %s1930_s20 = scalar_lea.vmem %s1929_s0, 256 }
 0x23e   : > { %1043 = vrot.lane.b32.xlu1 %v526_v41, %s1996_s28  ;;  %s1559_s28 = sshll.u32 %s404_s1, 4  ;;  %s2461_s28 = int_to_ptr.vmem [resolvable:$true] %s1559_s28 }
 0x23f   : > { %s1924_s19 = scalar_lea.vmem %s2461_s28, 128  ;;  %p1931_p0 = scmp.lt.s32.totalorder %s2461_s28, %s1929_s0 }
 0x240   : > { %p1925_p11 = scmp.ne.s32.totalorder %s2461_s28, %s1924_s19  ;;  %p1932_p1 = scmp.lt.s32.totalorder %s1930_s20, %s1924_s19 }
 0x242   : > { %p1926_p12 = pnand %p1925_p11, %p2103_p5  ;;  %p1933_p2 = por %p1932_p1, %p1931_p0 }
 0x244   : > { %p1927_p13 = pneg %p1926_p12 }
 0x246   : > { %p1934_p3 = pnand %p1933_p2, %p1927_p13 }
 0x29c   : > { %v539_v45 = vpop.permute.xlu1 %538  ;;  %v634_v49 = vpop.permute.xlu0 %633 }
 0x29d   : > { %1714 = vmatpush3.xpose.msk.msra.mxu1 %vm540_vm4, %v539_v45 }
 0x29e   : > { %1718 = vmatprep.subr.mxu1 %v1988_v20 }
 0x2a0   : > { %1716 = vmatmul.mubr.msk.f32.vlgmr.msra.gmra.mrb[2].mxu1 %vm540_vm4, %v526_v41  ;;  %v636_v47 = vpop.permute.xlu1 %635  ;;  %v1218_v41 = vld [vmem:[%s2506_s4 + $0x30] sm:$0xff] }
 0x2a1   : > { %1719 = vmatpush3.xpose.msk.msra.mxu1 %vm540_vm4, %v636_v47  ;;  %1720 = vmatprep.mubr.msk.f32.mxu1 %vm1989_vm1, %v1988_v20  ;;  %v1798_v45 = vpack.c.bf16 %v1219_v43, %v1218_v41  ;;  %v1452_v41 = vld [vmem:[%s2512_s10 + $0x90] sm:$0xff]  ;;  %v1453_v43 = vld [vmem:[%s2512_s10 + $0x98] sm:$0xff] }
 0x2a2   : > { %1723 = vmatprep.subr.mxu1 %v1988_v20 }
 0x2a4   : > { %1721 = vmatmul.mubr.msk.f32.vlgmr.msra.gmra.mrb[4].mxu1 %vm540_vm4, %v634_v49  ;;  %v877_v50 = vpop.permute.xlu1 %876 }
 0x2a5   : > { %1724 = vmatpush3.msra.mxu1 %v727_v48  ;;  %1734 = vmatpush3.xpose.msk.msra.mxu0 %vm540_vm4, %v877_v50  ;;  %v1629_v48 = vsel %vm628_vm8, 1.0, %v1988_v20 }
 0x2a6   : > { %1743 = vmatprep.subr.mxu0 %v1988_v20  ;;  %1725 = vmatprep.mubr.msk.f32.mxu1 %vm1989_vm1, %v1988_v20 }
 0x2a7   : > { %1728 = vmatprep.subr.mxu1 %v1988_v20 }
 0x2a8   : > { %v875_v51 = vpop.permute.xlu1 %874 }
 0x2a9   : > { %1736 = vmatmul.mubr.msk.f32.vlgmr.msra.gmra.mrb[0].mxu0 %vm540_vm4, %v875_v51 }
 0x2aa   : > { %1745 = vmatprep.mubr.msk.f32.mxu0 %vm1989_vm1, %v1988_v20 }
 0x2ac   : > { %v1046_v52 = vpop.permute.xlu1 %1045 }
 0x2ad   : > { %1744 = vmatpush3.xpose.msk.msra.mxu0 %vm540_vm4, %v1046_v52  ;;  %v632_v52 = vmul.f32 %v1629_v48, %v2186_v42  ;;  %v1437_v48 = vld [vmem:[%s2512_s10 + $0x18] sm:$0xff] }
 0x2ae   : > { %1788 = vmatprep.subr.bf16.mxu0 %v1998_v34 }
 0x2b0   : > { %v1044_v53 = vpop.permute.xlu1 %1043 }
 0x2b1   : > { %1746 = vmatmul.mubr.msk.f32.vlgmr.msra.gmra.mrb[2].mxu0 %vm540_vm4, %v1044_v53 }
 0x2b2   : > { %1769 = vmatprep.mubr.msk.f32.mxu0 %vm1989_vm1, %v1988_v20  ;;  %1790 = vmatpush3.bf16.msra.mxu0 %v1789_v35 }
 0x2b3   : > { %1791 = vmatprep.subr.bf16.mxu0 %v1998_v34 }
 0x2b6   : > { %1793 = vmatpush3.bf16.msra.mxu0 %v1792_v37  ;;  %v1451_v37 = vld [vmem:[%s2512_s10 + $0x88] sm:$0xff] }
 0x2b7   : > { %1794 = vmatprep.subr.bf16.mxu0 %v1998_v34  ;;  %v1816_v39 = vpack.c.bf16 %v1451_v37, %v1450_v36 }
 0x2ba   : > { %1796 = vmatpush3.bf16.msra.mxu0 %v1795_v40  ;;  %v1435_v40 = vld [vmem:[%s2512_s10 + $0x8] sm:$0xff] }
 0x2bb   : > { %1797 = vmatprep.subr.bf16.mxu0 %v1998_v34  ;;  %v1344_v34 = vld [vmem:[%s2510_s8 + $0x70] sm:$0xff] }
 0x2bc   : > { %v1814_v35 = vpack.c.bf16 %v1344_v34, %v1342_v33  ;;  %v1354_v33 = vsub.s32 1, %v2214_v54 }
 0x2be   : > { %1799 = vmatpush3.bf16.msra.mxu0 %v1798_v45  ;;  %v1818_v45 = vpack.c.bf16 %v1435_v40, %v1434_v38 }
 0x2bf   : > { %1817 = vmatprep.subr.bf16.mxu0 %v1816_v39 }
 0x373   : > { %v611_v57 = vpop.f32.mrb[2].mxu1 }
 0x374   : > { %v612_v58 = vadd.f32 %v611_v57, %v536_v56  ;;  %v1717_v59 = vpop.f32.mrb[3].mxu1 }
 0x376   : > { %v616_v60 = vsel %vm615_vm7, %v612_v58, -inf }
 0x377   : > { %617 = vmax.xlane.f32.xlu0 %v616_v60  ;;  %v707_v61 = vpop.f32.mrb[4].mxu1  ;;  %v1641_v60 = vsel %vm1134_vm14, 1.0, %v1988_v20 }
 0x378   : > { %v708_v62 = vadd.f32 %v707_v61, %v536_v56  ;;  %v1722_v63 = vpop.f32.mrb[5].mxu1  ;;  %v1137_v44 = vmul.f32 %v1641_v60, %v2186_v42  ;;  %v1440_v60 = vld [vmem:[%s2512_s10 + $0x30] sm:$0xff] }
 0x37a   : > { %v711_v1 = vsel %vm615_vm7, %v708_v62, -inf }
 0x37b   : > { %712 = vmax.xlane.f32.xlu1 %v711_v1 }
 0x37c   : > { %v948_v2 = vpop.f32.mrb[0].mxu0 }
 0x37d   : > { %v949_v3 = vadd.f32 %v948_v2, %v536_v56  ;;  %v1737_v4 = vpop.f32.mrb[1].mxu0 }
 0x37f   : > { %v952_v5 = vsel %vm615_vm7, %v949_v3, -inf }
 0x380   : > { %953 = vmax.xlane.f32.xlu1 %v952_v5 }
 0x384   : > { %v1117_v6 = vpop.f32.mrb[2].mxu0 }
 0x385   : > { %v1118_v7 = vadd.f32 %v1117_v6, %v536_v56  ;;  %v1747_v8 = vpop.f32.mrb[3].mxu0 }
 0x387   : > { %v1121_v9 = vsel %vm615_vm7, %v1118_v7, -inf }
 0x388   : > { %1122 = vmax.xlane.f32.xlu0 %v1121_v9 }
 0x404   : > { %v618_v10 = vpop.xlane.xlu0 %617 }
 0x405   : > { %v619_v11 = vsub.f32 %v612_v58, %v618_v10  ;;  %v968_v58 = vmul.f32 %v1637_v55, %v2186_v42  ;;  %v1643_v42 = vld [vmem:[%s2507_s5] ss:$0 sm:$0xff]  ;;  %v1439_v55 = vld [vmem:[%s2512_s10 + $0x28] sm:$0xff] }
 0x407   : > { %v620_v12 = vmul.f32 1.442695, %v619_v11 }
 0x408   : > { %v713_v13 = vpop.xlane.xlu1 %712 }
 0x409   : > { %1906 = vpow2.f32 %v620_v12  ;;  %v714_v14 = vsub.f32 %v708_v62, %v713_v13  ;;  %v1333_v12 = vld [vmem:[%s2510_s8 + $0x18] sm:$0xff] }
 0x40b   : > { %v715_v15 = vmul.f32 1.442695, %v714_v14  ;;  %v1330_v14 = vld [vmem:[%s2510_s8] sm:$0xff] }
 0x40d   : > { %1908 = vpow2.f32 %v715_v15  ;;  %v954_v16 = vpop.xlane.xlu1 %953  ;;  %v1332_v15 = vld [vmem:[%s2510_s8 + $0x10] sm:$0xff] }
 0x40e   : > { %v955_v17 = vsub.f32 %v949_v3, %v954_v16  ;;  %v1802_v16 = vpack.c.bf16 %v1332_v15, %v1330_v14 }
 0x410   : > { %v956_v18 = vmul.f32 1.442695, %v955_v17  ;;  %v1335_v17 = vld [vmem:[%s2510_s8 + $0x28] sm:$0xff] }
 0x412   : > { %1910 = vpow2.f32 %v956_v18  ;;  %v1337_v18 = vld [vmem:[%s2510_s8 + $0x38] sm:$0xff] }
 0x413   : > { %v1907_v19 = vpop.eup %1906 }
 0x414   : > { %v622_v21 = vsel %vm615_vm7, %v1907_v19, 0.0 }
 0x415   : > { %623 = vadd.xlane.f32.xlu0 %v622_v21  ;;  %v1123_v22 = vpop.xlane.xlu0 %1122  ;;  %v1334_v21 = vld [vmem:[%s2510_s8 + $0x20] sm:$0xff] }
 0x416   : > { %v1124_v23 = vsub.f32 %v1118_v7, %v1123_v22  ;;  %v1336_v22 = vld [vmem:[%s2510_s8 + $0x30] sm:$0xff] }
 0x417   : > { %v1909_v24 = vpop.eup %1908 }
 0x418   : > { %v1125_v25 = vmul.f32 1.442695, %v1124_v23  ;;  %v717_v26 = vsel %vm615_vm7, %v1909_v24, 0.0  ;;  %v1806_v23 = vpack.c.bf16 %v1336_v22, %v1334_v21 }
 0x419   : > { %718 = vadd.xlane.f32.xlu1 %v717_v26 }
 0x41a   : > { %1912 = vpow2.f32 %v1125_v25  ;;  %v1341_v25 = vld [vmem:[%s2510_s8 + $0x58] sm:$0xff] }
 0x41c   : > { %v1911_v27 = vpop.eup %1910 }
 0x41d   : > { %v958_v28 = vsel %vm615_vm7, %v1911_v27, 0.0 }
 0x41e   : > { %959 = vadd.xlane.f32.xlu1 %v958_v28  ;;  %v1340_v28 = vld [vmem:[%s2510_s8 + $0x50] sm:$0xff] }
 0x424   : > { %v2225_v29 = vpop.eup %1912 }
 0x425   : > { %v1127_v30 = vsel %vm615_vm7, %v2225_v29, 0.0 }
 0x426   : > { %1128 = vadd.xlane.f32.xlu0 %v1127_v30  ;;  %v1343_v30 = vld [vmem:[%s2510_s8 + $0x68] sm:$0xff] }
 0x427   : > { %v1812_v32 = vpack.c.bf16 %v1345_v31, %v1343_v30  ;;  %v1350_v31 = vsub.s32 0, %v2214_v54 }
 0x4a2   : > { %v624_v47 = vpop.xlane.xlu0 %623 }
 0x4a6   : > { %v719_v46 = vpop.xlane.xlu1 %718 }
 0x4a7   : > { %1914 = vrcp.f32 %v719_v46  ;;  %v1820_v46 = vpack.c.bf16 %v1453_v43, %v1452_v41 }
 0x4a8   : > { %1916 = vrcp.f32 %v624_v47  ;;  %v1436_v47 = vld [vmem:[%s2512_s10 + $0x10] sm:$0xff] }
 0x4ab   : > { %v960_v51 = vpop.xlane.xlu1 %959 }
 0x4ac   : > { %1918 = vrcp.f32 %v960_v51  ;;  %v1822_v51 = vpack.c.bf16 %v1437_v48, %v1436_v47 }
 0x4b1   : > { %v1915_v49 = vpop.eup %1914 }
 0x4b2   : > { %v721_v50 = vmul.f32 %v1915_v49, %v1909_v24  ;;  %v1917_v53 = vpop.eup %1916  ;;  %v1339_v24 = vld [vmem:[%s2510_s8 + $0x48] sm:$0xff]  ;;  %v1454_v49 = vld [vmem:[%s2512_s10 + $0xa0] sm:$0xff] }
 0x4b3   : > { %v626_v56 = vmul.f32 %v1917_v53, %v1907_v19  ;;  %v1129_v57 = vpop.xlane.xlu0 %1128  ;;  %v1804_v19 = vpack.c.bf16 %v1337_v18, %v1335_v17  ;;  %v1808_v26 = vpack.c.bf16 %v1341_v25, %v1339_v24  ;;  %v1438_v53 = vld [vmem:[%s2512_s10 + $0x20] sm:$0xff]  ;;  %v1447_v24 = vld [vmem:[%s2512_s10 + $0x68] sm:$0xff] }
 0x4b4   : > { %1726 = vmatmul.mubr.msk.f32.vlgmr.msra.gmra.mrb[6].mxu1 %vm615_vm7, %v721_v50  ;;  %1920 = vrcp.f32 %v1129_v57  ;;  %v1455_v50 = vld [vmem:[%s2512_s10 + $0xa8] sm:$0xff]  ;;  %v1457_v57 = vld [vmem:[%s2512_s10 + $0xb8] sm:$0xff]  ;;  %v1645_v17 = vld [vmem:[%s2508_s6] ss:$0 sm:$0xff] }
 0x4b5   : > { %1729 = vmatpush3.msra.mxu1 %v632_v52  ;;  %1730 = vmatprep.mubr.msk.f32.mxu1 %vm1989_vm1, %v1988_v20  ;;  %v1824_v52 = vpack.c.bf16 %v1455_v50, %v1454_v49 }
 0x4b6   : > { %1738 = vmatprep.subr.mxu1 %v1988_v20  ;;  %v1919_v59 = vpop.eup %1918 }
 0x4b7   : > { %v962_v61 = vmul.f32 %v1919_v59, %v1911_v27  ;;  %v1338_v27 = vld [vmem:[%s2510_s8 + $0x40] sm:$0xff] }
 0x4bc   : > { %1731 = vmatmul.mubr.msk.f32.vlgmr.msra.gmra.mrb[6].mxu1 %vm615_vm7, %v626_v56  ;;  %v1456_v56 = vld [vmem:[%s2512_s10 + $0xb0] sm:$0xff] }
 0x4bd   : > { %1739 = vmatpush3.msra.mxu1 %v968_v58  ;;  %1740 = vmatprep.mubr.msk.f32.mxu1 %vm1989_vm1, %v1988_v20  ;;  %v1826_v58 = vpack.c.bf16 %v1439_v55, %v1438_v53  ;;  %v1828_v59 = vpack.c.bf16 %v1457_v57, %v1456_v56 }
 0x4be   : > { %1748 = vmatprep.subr.mxu1 %v1988_v20  ;;  %v1921_v62 = vpop.eup %1920 }
 0x4bf   : > { %v1131_v63 = vmul.f32 %v1921_v62, %v2225_v29  ;;  %v1810_v29 = vpack.c.bf16 %v1340_v28, %v1338_v27  ;;  %v1459_v62 = vld [vmem:[%s2512_s10 + $0xc8] sm:$0xff]  ;;  %v1448_v28 = vld [vmem:[%s2512_s10 + $0x70] sm:$0xff] }
 0x4c4   : > { %1741 = vmatmul.mubr.msk.f32.vlgmr.msra.gmra.mrb[6].mxu1 %vm615_vm7, %v962_v61  ;;  %v1441_v61 = vld [vmem:[%s2512_s10 + $0x38] sm:$0xff] }
 0x4c5   : > { %1749 = vmatpush3.msra.mxu1 %v1137_v44  ;;  %1750 = vmatprep.mubr.msk.f32.mxu1 %vm1989_vm1, %v1988_v20  ;;  %v1458_v44 = vld [vmem:[%s2512_s10 + $0xc0] sm:$0xff] }
 0x4cc   : > { %1751 = vmatmul.mubr.msk.f32.vlgmr.msra.gmra.mrb[6].mxu1 %vm615_vm7, %v1131_v63  ;;  %v1830_v63 = vpack.c.bf16 %v1441_v61, %v1440_v60 }
 0x4cd   : > { %1425 = vmatprep.mubr.f32.mxu1 %v1988_v20 }
 0x59f   : > { %v1207_v1 = vpop.f32.mrb[6].mxu1 }
 0x5a0   : > { %v1752_v2 = vpop.f32.mrb[7].mxu1  ;;  %1770 = vmatmul.mubr.msk.f32.vlgmr.msra.gmra.mrb[4].mxu0 %vm412_vm0, %v1207_v1  ;;  %v1832_v1 = vpack.c.bf16 %v1459_v62, %v1458_v44 }
 0x5a1   : > { %1819 = vmatpush3.bf16.msra.mxu0 %v1818_v45  ;;  %v1442_v2 = vld [vmem:[%s2512_s10 + $0x40] sm:$0xff] }
 0x5a2   : > { %1821 = vmatprep.subr.bf16.mxu0 %v1820_v46  ;;  %v1648_v45 = vld [vmem:[%s2513_s11] ss:$0 sm:$0xff] }
 0x5a5   : > { %1823 = vmatpush3.bf16.msra.mxu0 %v1822_v51 }
 0x5a6   : > { %1825 = vmatprep.subr.bf16.mxu0 %v1824_v52 }
 0x5a9   : > { %1827 = vmatpush3.bf16.msra.mxu0 %v1826_v58 }
 0x5aa   : > { %1829 = vmatprep.subr.bf16.mxu0 %v1828_v59 }
 0x5ad   : > { %1831 = vmatpush3.bf16.msra.mxu0 %v1830_v63 }
 0x5ae   : > { %1833 = vmatprep.subr.bf16.mxu0 %v1832_v1 }
 0x673   : > { %v1296_v3 = vpop.f32.mrb[4].mxu0 }
 0x674   : > { %v1297_v4 = vadd.f32 %v1643_v42, %v1296_v3  ;;  %v1771_v5 = vpop.f32.mrb[5].mxu0  ;;  %v1443_v42 = vld [vmem:[%s2512_s10 + $0x48] sm:$0xff]  ;;  %v1460_v3 = vld [vmem:[%s2512_s10 + $0xd0] sm:$0xff] }
 0x675   : > { %v1834_v5 = vpack.c.bf16 %v1443_v42, %v1442_v2 }
 0x676   : > { %v2283_v6 = vadd.f32 %v1297_v4, %v2118_v0  ;;  %v1331_v0 = vld [vmem:[%s2510_s8 + $0x8] sm:$0xff]  ;;  %v1461_v4 = vld [vmem:[%s2512_s10 + $0xd8] sm:$0xff] }
 0x677   : > { %v1800_v13 = vpack.c.bf16 %v1333_v12, %v1331_v0  ;;  %1835 = vmatpush3.bf16.msra.mxu0 %v1834_v5 }
 0x678   : > { %v1303_v7 = vsel %vm412_vm0, %v2283_v6, 0.0 }
 0x679   : > { %1304 = vadd.xlane.f32.xlu1 %v1303_v7  ;;  %1801 = vmatprep.subr.bf16.mxu1 %v1800_v13  ;;  %v1836_v7 = vpack.c.bf16 %v1461_v4, %v1460_v3 }
 0x67a   : > { %1803 = vmatpush1.bf16.msra.mxu1 %v1802_v16 }
 0x67b   : > { %1805 = vmatprep.subr.bf16.mxu1 %v1804_v19  ;;  %1837 = vmatprep.subr.bf16.mxu0 %v1836_v7  ;;  %v1646_v19 = vld [vmem:[%s2509_s7] ss:$0 sm:$0xff] }
 0x67e   : > { %1807 = vmatpush1.bf16.msra.mxu1 %v1806_v23  ;;  %v1446_v23 = vld [vmem:[%s2512_s10 + $0x60] sm:$0xff] }
 0x67f   : > { %1809 = vmatprep.subr.bf16.mxu1 %v1808_v26  ;;  %v1842_v25 = vpack.c.bf16 %v1447_v24, %v1446_v23  ;;  %v1465_v26 = vld [vmem:[%s2512_s10 + $0xf8] sm:$0xff] }
 0x682   : > { %1811 = vmatpush1.bf16.msra.mxu1 %v1810_v29  ;;  %v1449_v29 = vld [vmem:[%s2512_s10 + $0x78] sm:$0xff] }
 0x683   : > { %1813 = vmatprep.subr.bf16.mxu1 %v1812_v32  ;;  %v1846_v30 = vpack.c.bf16 %v1449_v29, %v1448_v28  ;;  %v1346_v32 = vld [vmem:[%s2511_s9] sm:$0x3] }
 0x684   : > { %v1351_v34 = vrot.slane %v1346_v32, %v1350_v31 }
 0x686   : > { %1815 = vmatpush1.bf16.msra.mxu1 %v1814_v35  ;;  %v1355_v35 = vrot.slane %v1346_v32, %v1354_v33 }
 0x706   : > { %v1305_v8 = vpop.xlane.xlu1 %1304 }
 0x707   : > { %v1306_v20 = vmul.f32 0.015625, %v1305_v8  ;;  %v1444_v8 = vld [vmem:[%s2512_s10 + $0x50] sm:$0xff] }
 0x709   : > { %v2288_v9 = vsub.f32 %v2283_v6, %v1306_v20  ;;  %v1445_v20 = vld [vmem:[%s2512_s10 + $0x58] sm:$0xff] }
 0x70a   : > { %v1838_v0 = vpack.c.bf16 %v1445_v20, %v1444_v8 }
 0x70b   : > { %v1308_v10 = vmul.f32 %v2288_v9, %v2288_v9 }
 0x70c   : > { %1839 = vmatpush3.bf16.msra.mxu0 %v1838_v0 }
 0x70d   : > { %v1309_v11 = vsel %vm412_vm0, %v1308_v10, 0.0  ;;  %v1462_v10 = vld [vmem:[%s2512_s10 + $0xe0] sm:$0xff] }
 0x70e   : > { %1310 = vadd.xlane.f32.xlu0 %v1309_v11  ;;  %v1463_v11 = vld [vmem:[%s2512_s10 + $0xe8] sm:$0xff] }
 0x70f   : > { %v1840_v12 = vpack.c.bf16 %v1463_v11, %v1462_v10 }
 0x711   : > { %1841 = vmatprep.subr.bf16.mxu0 %v1840_v12 }
 0x712   : > { %1843 = vmatpush3.bf16.msra.mxu0 %v1842_v25 }
 0x79b   : > { %v1311_v13 = vpop.xlane.xlu0 %1310 }
 0x79c   : > { %v1312_v14 = vmul.f32 0.015625, %v1311_v13 }
 0x79e   : > { %v1313_v15 = vadd.f32 1e-05, %v1312_v14 }
 0x7a0   : > { %1922 = vrsqrt.f32 %v1313_v15 }
 0x7aa   : > { %v1923_v16 = vpop.eup %1922 }
 0x7ab   : > { %v1315_v18 = vmul.f32 %v1923_v16, %v2288_v9  ;;  %v1464_v9 = vld [vmem:[%s2512_s10 + $0xf0] sm:$0xff] }
 0x7ac   : > { %v1844_v27 = vpack.c.bf16 %v1465_v26, %v1464_v9 }
 0x7ad   : > { %v1322_v21 = vmul.f32 %v1645_v17, %v1315_v18 }
 0x7ae   : > { %1845 = vmatprep.subr.bf16.mxu0 %v1844_v27 }
 0x7af   : > { %v1329_v22 = vadd.f32 %v1646_v19, %v1322_v21  ;;  %1847 = vmatpush3.bf16.msra.mxu0 %v1846_v30 }
 0x7b1   : > { %1647 = vmatmul.mubr.msk.f32.vlgmr.msra.gmra.mrb[8].mxu1 %vm412_vm0, %v1329_v22 }
 0x884   : > { %v1427_v36 = vpop.f32.mrb[8].mxu1 }
 0x885   : > { %v1428_v37 = vadd.f32 %v1427_v36, %v1351_v34  ;;  %v1429_v38 = vpop.f32.mrb[9].mxu1 }
 0x886   : > { %v1430_v39 = vadd.f32 %v1429_v38, %v1355_v35 }
 0x887   : > { %v1432_v41 = vmax.f32 %v1428_v37, 0.0 }
 0x888   : > { %v1433_v40 = vmax.f32 %v1430_v39, 0.0 }
 0x88a   : > { %1537 = vmatprep.mubr.f32.mxu0 %v1433_v40 }
 0x88b   : > { %1538 = vmatmul.mubr.f32.vlgmr.msra.gmra.mrb[6].mxu0 %v1432_v41 }
 0x95e   : > { %v1710_v43 = vpop.f32.mrb[6].mxu0 }
 0x95f   : > { %v1711_v54 = vpop.f32.mrb[7].mxu0 }
 0x960   : > { %v1712_v46 = vadd.f32 %v1711_v54, %v1710_v43 }
 0x962   : > { %v1540_v47 = vadd.f32 %v1712_v46, %v1648_v45 }
 0x964   : > { %v1543_v48 = vadd.f32 %v1540_v47, %v2283_v6 }
 0x966   : > { %1544 = vst.msk [vmem:[%s404_s1] sm:$0xff] %vm412_vm0, %v1543_v48 }
 0x967   : > { %1937 = shalt.err (!%p1934_p3)
}
 0x968   : > { %s1938_s18 = scalar_lea.hbm %s2459_s16, 128  ;;  %s1942_s29 = scalar_lea.hbm %s2514_s12, 256 }
 0x969   : > { %p1939_p4 = scmp.ne.s32.totalorder %s2459_s16, %s1938_s18  ;;  %p1943_p9 = scmp.lt.u32.totalorder %s2459_s16, %s2514_s12 }
 0x96a   : > { %p1944_p10 = scmp.lt.u32.totalorder %s1942_s29, %s1938_s18  ;;  %p1946_p12 = scmp.lt.u32.totalorder %s1938_s18, %s2459_s16 }
 0x96b   : > { %p1940_p7 = pnand %p1939_p4, %p2103_p5 }
 0x96c   : > { %p1945_p11 = por %p1944_p10, %p1943_p9 }
 0x96d   : > { %p1941_p8 = pneg %p1940_p7 }
 0x96e   : > { %p1947_p13 = por %p1946_p12, %p1945_p11 }
 0x970   : > { %p1948_p0 = pnand %p1947_p13, %p1941_p8 }
 0x972   : > { %1951 = shalt.err (!%p1948_p0)
}
 0x973   : > { %1854 = dma.vmem_to_hbm [thread:$0]  (%p2103_p5), %s2461_s28, 128, %s2459_s16, %s1546_s17  }
 0x974 PF: > { %p1860_p1 = scmp.ge.s32.totalorder %s1986_s24, 2  ;;  %s1571_s19 = sand.u32 1, %s1974_s21  }
 0x975   : > { %s1572_s0 = scalar_lea.sflag [#allocation3], %s1571_s19 }
 0x976   : > { %p1857_p2 = pnand %p1860_p1, %p2107_p6 }
 0x978   : > { %1969 = dma.done.wait (!%p1857_p2), %s1572_s0, 128  }
 0x979   : > { %1971 = vsyncadd (!%p1857_p2), %s1572_s0, 4294967168  ;;  %p22_p3 = scmp.ge.s32.totalorder %s2090_s27, 4   ;;  %s2521_s21 = smov %s1978_s22 }
 0x97a   : > { %s2522_s22 = smov %s1982_s23  ;;  %s2523_s23 = smov %s2101_s30 }
 0x97b   : > { %s2524_s24 = smov %s2090_s27  ;;  %24 = sbr.rel (!%p22_p3) target bundleno = 6 (0x6), region = 103 }
 0x982   :  { %1577 = vsyncpa [#allocation3], 1 }
 0x983   :  { %1579 = vsyncpa [#allocation3 + $0x1], 1 }

</bundles_post_ra>
